<compile_context>
chip_gen: v7x
topology: tpu7x:2x2x1
jax: 0.10.0
libtpu: 0.0.40
codegen_flags: <defaults>
</compile_context>

<pallas_src>
import functools

import jax
import jax.numpy as jnp
from jax.experimental import pallas as pl
from jax.experimental.pallas import tpu as pltpu


def _round_up(n, m):
    return ((n + m - 1) // m) * m


def _tree_sum(terms):
    """Pairwise (tree) reduction — halves the serial VALU add depth."""
    terms = list(terms)
    while len(terms) > 1:
        nxt = [a + b for a, b in zip(terms[0::2], terms[1::2])]
        if len(terms) % 2:
            nxt.append(terms[-1])
        terms = nxt
    return terms[0]


def _lstm_fc_kernel(x_ref, p_ref, out_ref, *, T, I, H):
    """1-layer LSTM over T steps + Linear on the last hidden state.

    x_ref:   (B, T*I)       f32, batch-major (row b = [x[b,0,:], x[b,1,:], ...])
    p_ref:   (I+2H+4, PADW) f32 packed params (see prepare_params for layout)
    out_ref: (B, PADW)      f32, lanes [0, O) hold the result, rest are zero
    """
    B = x_ref.shape[0]
    H4 = 4 * H
    PADW = out_ref.shape[1]

    x = x_ref[...]                                            # (B, T*I)

    # Hoist every row broadcast out of the loop.
    w_ih_rows = [jnp.broadcast_to(p_ref[j:j + 1, 0:H4], (B, H4)) for j in range(I)]
    w_hh_rows = [jnp.broadcast_to(p_ref[I + k:I + k + 1, 0:H4], (B, H4)) for k in range(H)]
    bias      = jnp.broadcast_to(p_ref[I + H:I + H + 1, 0:H4], (B, H4))
    act_scale = jnp.broadcast_to(p_ref[I + H + 1:I + H + 2, 0:H4], (B, H4))
    act_shift = jnp.broadcast_to(p_ref[I + H + 2:I + H + 3, 0:H4], (B, H4))
    fc_rows   = [jnp.broadcast_to(p_ref[I + H + 3 + k:I + H + 4 + k, :], (B, PADW))
                 for k in range(H)]
    fc_bias   = jnp.broadcast_to(p_ref[I + 2 * H + 3:I + 2 * H + 4, :], (B, PADW))

    h = jnp.zeros((B, H), jnp.float32)
    c = jnp.zeros((B, H), jnp.float32)

    # Fully-unrolled recurrence (T is static): all slices static, full
    # scheduler visibility, no MXU round-trips anywhere.
    for t in range(T):
        # Input projection for step t: I broadcast-MACs, independent of h/c so
        # the scheduler can pull it off the serial h->h chain.
        xg = _tree_sum([x[:, t * I + j:t * I + j + 1] * w_ih_rows[j]
                        for j in range(I)]) + bias

        # Recurrent part: H broadcast-MACs, tree-reduced.
        gates = xg + _tree_sum([h[:, k:k + 1] * w_hh_rows[k] for k in range(H)])

        # Single EUP push for all 4 gates: sigmoid(z) = 0.5*tanh(0.5 z) + 0.5.
        # The 0.5 pre-scale of the (i, f, o) columns is folded into the packed
        # weights/bias, so one tanh + one lane-vector FMA covers everything.
        act = jnp.tanh(gates) * act_scale + act_shift          # (B, 4H)

        # Gate order after packing is (i, f, o, g).  The lane-offset slices
        # cost a few XLU rotates per step; the XLU is otherwise idle here (no
        # MXU in this kernel) so they overlap with the VPU cell update.
        i_g = act[:, 0:H]
        f_g = act[:, H:2 * H]
        o_g = act[:, 2 * H:3 * H]
        g_g = act[:, 3 * H:H4]

        c = f_g * c + i_g * g_g
        h = o_g * jnp.tanh(c)                                  # 2nd (last) EUP push

    # Final Linear on the last hidden state: H broadcast-MACs, tree-reduced,
    # stored lane-dense into the 128-lane-padded output (unmasked store).
    out_ref[...] = _tree_sum([h[:, k:k + 1] * fc_rows[k] for k in range(H)]) + fc_bias


def prepare_params(params):
    """One-time transform of PyTorch-layout LSTM/Linear params into the single
    packed f32 array consumed by the kernel.  Call once at setup, NOT per call.

    Packed layout, width PADW = max(128, round_up(4H,128), round_up(O,128)):
      rows [0, I)           : W_ih^T, gate cols permuted (i,f,g,o)->(i,f,o,g),
                              (i,f,o) cols pre-scaled by 0.5      [lanes 0:4H]
      rows [I, I+H)         : W_hh^T, same treatment              [lanes 0:4H]
      row  I+H              : b_ih + b_hh, same treatment         [lanes 0:4H]
      row  I+H+1            : activation post-scale (0.5 | 1.0)   [lanes 0:4H]
      row  I+H+2            : activation post-shift (0.5 | 0.0)   [lanes 0:4H]
      rows [I+H+3, I+2H+3)  : fc_W^T, zero-padded to PADW lanes
      row  I+2H+3           : fc_b,   zero-padded to PADW lanes
    """
    H = params["w_hh"].shape[1]
    I = params["w_ih"].shape[1]
    O = params["fc_w"].shape[0]
    H4 = 4 * H
    PADW = max(128, _round_up(H4, 128), _round_up(O, 128))

    w_ih_t = jnp.asarray(params["w_ih"], jnp.float32).T       # (I, 4H), cols i,f,g,o
    w_hh_t = jnp.asarray(params["w_hh"], jnp.float32).T       # (H, 4H)
    b = (jnp.asarray(params["b_ih"], jnp.float32)
         + jnp.asarray(params["b_hh"], jnp.float32)).reshape(1, H4)

    # Permute gate columns (i, f, g, o) -> (i, f, o, g): contiguous sigmoid
    # block [0:3H) and tanh block [3H:4H).
    perm = jnp.concatenate([jnp.arange(0, 2 * H),
                            jnp.arange(3 * H, 4 * H),
                            jnp.arange(2 * H, 3 * H)])
    w_ih_t, w_hh_t, b = w_ih_t[:, perm], w_hh_t[:, perm], b[:, perm]

    # Fold the sigmoid pre-scale (sigmoid(z) = 0.5*tanh(0.5 z) + 0.5) into the
    # (i, f, o) columns so the kernel needs no per-step pre-multiply.
    pre = jnp.concatenate([jnp.full((1, 3 * H), 0.5, jnp.float32),
                           jnp.ones((1, H), jnp.float32)], axis=1)
    w_ih_t, w_hh_t, b = w_ih_t * pre, w_hh_t * pre, b * pre

    act_scale = pre                                            # 0.5 | 1.0
    act_shift = jnp.concatenate([jnp.full((1, 3 * H), 0.5, jnp.float32),
                                 jnp.zeros((1, H), jnp.float32)], axis=1)

    fc_w_t = jnp.asarray(params["fc_w"], jnp.float32).T        # (H, O)
    fc_b = jnp.asarray(params["fc_b"], jnp.float32).reshape(1, O)

    pad = lambda a: jnp.pad(a, ((0, 0), (0, PADW - a.shape[1])))
    packed = jnp.concatenate(
        [pad(w_ih_t), pad(w_hh_t), pad(b), pad(act_scale), pad(act_shift),
         pad(fc_w_t), pad(fc_b)], axis=0)
    return packed                                              # (I + 2H + 4, PADW)


@functools.partial(jax.jit, static_argnums=(2,))
def rnn_stock_forward(x, packed_params, out_size):
    """x: (B, T, I) float32 -> (B, out_size) float32."""
    B, T, I = x.shape
    rows, PADW = packed_params.shape
    H = (rows - I - 4) // 2
    # Shape-consistency checks (trace-time, all static).
    assert rows == I + 2 * H + 4, "packed params rows inconsistent with input size"
    assert 4 * H <= PADW, "packed lane width must hold 4*hidden"
    assert out_size <= PADW, "out_size exceeds packed fc lane padding"

    # Free reshape (batch_first (B, T, I) is contiguous) — no transpose; the
    # whole wrapper is jitted so prep + kernel + slice dispatch together.
    x_flat = x.reshape(B, T * I).astype(jnp.float32)

    out_padded = pl.pallas_call(
        functools.partial(_lstm_fc_kernel, T=T, I=I, H=H),
        out_shape=jax.ShapeDtypeStruct((B, PADW), jnp.float32),
        # Arrays are tiny; whole-array (gridless) blocks live entirely in VMEM.
        in_specs=[
            pl.BlockSpec(memory_space=pltpu.MemorySpace.VMEM),
            pl.BlockSpec(memory_space=pltpu.MemorySpace.VMEM),
        ],
        out_specs=pl.BlockSpec(memory_space=pltpu.MemorySpace.VMEM),
    )(x_flat, packed_params)
    return out_padded[:, :out_size]


def init_params(key, input_size, hidden_size, out_size):
    """Deterministic init mimicking PyTorch's U(-1/sqrt(H), 1/sqrt(H))."""
    ks = jax.random.split(key, 6)
    bound = 1.0 / jnp.sqrt(jnp.float32(hidden_size))
    u = lambda k, shape: jax.random.uniform(
        k, shape, dtype=jnp.float32, minval=-bound, maxval=bound
    )
    return {
        "w_ih": u(ks[0], (4 * hidden_size, input_size)),   # gate rows: i, f, g, o
        "w_hh": u(ks[1], (4 * hidden_size, hidden_size)),
        "b_ih": u(ks[2], (4 * hidden_size,)),
        "b_hh": u(ks[3], (4 * hidden_size,)),
        "fc_w": u(ks[4], (out_size, hidden_size)),
        "fc_b": u(ks[5], (out_size,)),
    }


def _reference_forward(x, params):
    """Pure-JAX reference of the PyTorch forward for a sanity check."""
    B, T, I = x.shape
    H = params["w_hh"].shape[1]
    w_ih_t = params["w_ih"].T
    w_hh_t = params["w_hh"].T
    b = params["b_ih"] + params["b_hh"]
    h = jnp.zeros((B, H), jnp.float32)
    c = jnp.zeros((B, H), jnp.float32)
    for t in range(T):
        g = x[:, t, :] @ w_ih_t + h @ w_hh_t + b
        i_g = jax.nn.sigmoid(g[:, 0 * H:1 * H])
        f_g = jax.nn.sigmoid(g[:, 1 * H:2 * H])
        g_g = jnp.tanh(g[:, 2 * H:3 * H])
        o_g = jax.nn.sigmoid(g[:, 3 * H:4 * H])
        c = f_g * c + i_g * g_g
        h = o_g * jnp.tanh(c)
    return h @ params["fc_w"].T + params["fc_b"]


if __name__ == "__main__":
    input_size, hidden_size, num_layers, out_size = 2, 4, 1, 2
    B, T = 2, 8

    key = jax.random.PRNGKey(0)
    k_x, k_p = jax.random.split(key)
    x = jax.random.normal(k_x, (B, T, input_size), dtype=jnp.float32)
    params = init_params(k_p, input_size, hidden_size, out_size)

    # One-time parameter packing (gate-permuted, sigmoid pre-scale folded in,
    # fc padded lane-dense, single array -> single param DMA).
    packed = jax.block_until_ready(prepare_params(params))

    out = jax.block_until_ready(rnn_stock_forward(x, packed, out_size))

    ref = _reference_forward(x, params)
    assert out.shape == (B, out_size)
    assert jnp.allclose(out, ref, atol=1e-5, rtol=1e-5), (out, ref)

    print("KERNEL_OK")
</pallas_src>

<mosaic_0001>
module attributes {stable_mosaic.version = 11 : i64} {
  func.func @_lstm_fc_kernel(%arg0: memref<2x16xf32, #tpu.memory_space<vmem>>, %arg1: memref<14x128xf32, #tpu.memory_space<vmem>>, %arg2: memref<2x128xf32, #tpu.memory_space<vmem>>) attributes {dimension_semantics = [], scalar_prefetch = 0 : i64, scratch_operands = 0 : i64, tpu.core_type = #tpu.core_type<tc>} {
    %c0 = arith.constant 0 : index
    %c0_0 = arith.constant 0 : index
    %0 = vector.load %arg0[%c0, %c0_0] : memref<2x16xf32, #tpu.memory_space<vmem>>, vector<2x16xf32>
    %c0_1 = arith.constant 0 : index
    %c0_2 = arith.constant 0 : index
    %1 = vector.load %arg1[%c0_1, %c0_2] : memref<14x128xf32, #tpu.memory_space<vmem>>, vector<1x16xf32>
    %2 = vector.shape_cast %1 : vector<1x16xf32> to vector<1x16xf32>
    %3 = vector.broadcast %2 : vector<1x16xf32> to vector<2x16xf32>
    %c1 = arith.constant 1 : index
    %c0_3 = arith.constant 0 : index
    %4 = vector.load %arg1[%c1, %c0_3] : memref<14x128xf32, #tpu.memory_space<vmem>>, vector<1x16xf32>
    %5 = vector.shape_cast %4 : vector<1x16xf32> to vector<1x16xf32>
    %6 = vector.broadcast %5 : vector<1x16xf32> to vector<2x16xf32>
    %c2 = arith.constant 2 : index
    %c0_4 = arith.constant 0 : index
    %7 = vector.load %arg1[%c2, %c0_4] : memref<14x128xf32, #tpu.memory_space<vmem>>, vector<1x16xf32>
    %8 = vector.shape_cast %7 : vector<1x16xf32> to vector<1x16xf32>
    %9 = vector.broadcast %8 : vector<1x16xf32> to vector<2x16xf32>
    %c3 = arith.constant 3 : index
    %c0_5 = arith.constant 0 : index
    %10 = vector.load %arg1[%c3, %c0_5] : memref<14x128xf32, #tpu.memory_space<vmem>>, vector<1x16xf32>
    %11 = vector.shape_cast %10 : vector<1x16xf32> to vector<1x16xf32>
    %12 = vector.broadcast %11 : vector<1x16xf32> to vector<2x16xf32>
    %c4 = arith.constant 4 : index
    %c0_6 = arith.constant 0 : index
    %13 = vector.load %arg1[%c4, %c0_6] : memref<14x128xf32, #tpu.memory_space<vmem>>, vector<1x16xf32>
    %14 = vector.shape_cast %13 : vector<1x16xf32> to vector<1x16xf32>
    %15 = vector.broadcast %14 : vector<1x16xf32> to vector<2x16xf32>
    %c5 = arith.constant 5 : index
    %c0_7 = arith.constant 0 : index
    %16 = vector.load %arg1[%c5, %c0_7] : memref<14x128xf32, #tpu.memory_space<vmem>>, vector<1x16xf32>
    %17 = vector.shape_cast %16 : vector<1x16xf32> to vector<1x16xf32>
    %18 = vector.broadcast %17 : vector<1x16xf32> to vector<2x16xf32>
    %c6 = arith.constant 6 : index
    %c0_8 = arith.constant 0 : index
    %19 = vector.load %arg1[%c6, %c0_8] : memref<14x128xf32, #tpu.memory_space<vmem>>, vector<1x16xf32>
    %20 = vector.shape_cast %19 : vector<1x16xf32> to vector<1x16xf32>
    %21 = vector.broadcast %20 : vector<1x16xf32> to vector<2x16xf32>
    %c7 = arith.constant 7 : index
    %c0_9 = arith.constant 0 : index
    %22 = vector.load %arg1[%c7, %c0_9] : memref<14x128xf32, #tpu.memory_space<vmem>>, vector<1x16xf32>
    %23 = vector.shape_cast %22 : vector<1x16xf32> to vector<1x16xf32>
    %24 = vector.broadcast %23 : vector<1x16xf32> to vector<2x16xf32>
    %c8 = arith.constant 8 : index
    %c0_10 = arith.constant 0 : index
    %25 = vector.load %arg1[%c8, %c0_10] : memref<14x128xf32, #tpu.memory_space<vmem>>, vector<1x16xf32>
    %26 = vector.shape_cast %25 : vector<1x16xf32> to vector<1x16xf32>
    %27 = vector.broadcast %26 : vector<1x16xf32> to vector<2x16xf32>
    %c9 = arith.constant 9 : index
    %c0_11 = arith.constant 0 : index
    %28 = vector.load %arg1[%c9, %c0_11] : memref<14x128xf32, #tpu.memory_space<vmem>>, vector<1x128xf32>
    %29 = vector.shape_cast %28 : vector<1x128xf32> to vector<1x128xf32>
    %30 = vector.broadcast %29 : vector<1x128xf32> to vector<2x128xf32>
    %c10 = arith.constant 10 : index
    %c0_12 = arith.constant 0 : index
    %31 = vector.load %arg1[%c10, %c0_12] : memref<14x128xf32, #tpu.memory_space<vmem>>, vector<1x128xf32>
    %32 = vector.shape_cast %31 : vector<1x128xf32> to vector<1x128xf32>
    %33 = vector.broadcast %32 : vector<1x128xf32> to vector<2x128xf32>
    %c11 = arith.constant 11 : index
    %c0_13 = arith.constant 0 : index
    %34 = vector.load %arg1[%c11, %c0_13] : memref<14x128xf32, #tpu.memory_space<vmem>>, vector<1x128xf32>
    %35 = vector.shape_cast %34 : vector<1x128xf32> to vector<1x128xf32>
    %36 = vector.broadcast %35 : vector<1x128xf32> to vector<2x128xf32>
    %c12 = arith.constant 12 : index
    %c0_14 = arith.constant 0 : index
    %37 = vector.load %arg1[%c12, %c0_14] : memref<14x128xf32, #tpu.memory_space<vmem>>, vector<1x128xf32>
    %38 = vector.shape_cast %37 : vector<1x128xf32> to vector<1x128xf32>
    %39 = vector.broadcast %38 : vector<1x128xf32> to vector<2x128xf32>
    %c13 = arith.constant 13 : index
    %c0_15 = arith.constant 0 : index
    %40 = vector.load %arg1[%c13, %c0_15] : memref<14x128xf32, #tpu.memory_space<vmem>>, vector<1x128xf32>
    %41 = vector.shape_cast %40 : vector<1x128xf32> to vector<1x128xf32>
    %42 = vector.broadcast %41 : vector<1x128xf32> to vector<2x128xf32>
    %cst = arith.constant 0.000000e+00 : f32
    %43 = vector.broadcast %cst : f32 to vector<2x4xf32>
    %cst_16 = arith.constant 0.000000e+00 : f32
    %44 = vector.broadcast %cst_16 : f32 to vector<2x4xf32>
    %45 = vector.extract_strided_slice %0 {offsets = [0, 0], sizes = [2, 1], strides = [1, 1]} : vector<2x16xf32> to vector<2x1xf32>
    %46 = vector.broadcast %45 : vector<2x1xf32> to vector<2x16xf32>
    %47 = arith.mulf %46, %3 : vector<2x16xf32>
    %48 = vector.extract_strided_slice %0 {offsets = [0, 1], sizes = [2, 1], strides = [1, 1]} : vector<2x16xf32> to vector<2x1xf32>
    %49 = vector.broadcast %48 : vector<2x1xf32> to vector<2x16xf32>
    %50 = arith.mulf %49, %6 : vector<2x16xf32>
    %51 = arith.addf %47, %50 : vector<2x16xf32>
    %52 = arith.addf %51, %21 : vector<2x16xf32>
    %53 = vector.extract_strided_slice %43 {offsets = [0, 0], sizes = [2, 1], strides = [1, 1]} : vector<2x4xf32> to vector<2x1xf32>
    %54 = vector.broadcast %53 : vector<2x1xf32> to vector<2x16xf32>
    %55 = arith.mulf %54, %9 : vector<2x16xf32>
    %56 = vector.extract_strided_slice %43 {offsets = [0, 1], sizes = [2, 1], strides = [1, 1]} : vector<2x4xf32> to vector<2x1xf32>
    %57 = vector.broadcast %56 : vector<2x1xf32> to vector<2x16xf32>
    %58 = arith.mulf %57, %12 : vector<2x16xf32>
    %59 = vector.extract_strided_slice %43 {offsets = [0, 2], sizes = [2, 1], strides = [1, 1]} : vector<2x4xf32> to vector<2x1xf32>
    %60 = vector.broadcast %59 : vector<2x1xf32> to vector<2x16xf32>
    %61 = arith.mulf %60, %15 : vector<2x16xf32>
    %62 = vector.extract_strided_slice %43 {offsets = [0, 3], sizes = [2, 1], strides = [1, 1]} : vector<2x4xf32> to vector<2x1xf32>
    %63 = vector.broadcast %62 : vector<2x1xf32> to vector<2x16xf32>
    %64 = arith.mulf %63, %18 : vector<2x16xf32>
    %65 = arith.addf %55, %58 : vector<2x16xf32>
    %66 = arith.addf %61, %64 : vector<2x16xf32>
    %67 = arith.addf %65, %66 : vector<2x16xf32>
    %68 = arith.addf %52, %67 : vector<2x16xf32>
    %69 = math.tanh %68 : vector<2x16xf32>
    %70 = arith.mulf %69, %24 : vector<2x16xf32>
    %71 = arith.addf %70, %27 : vector<2x16xf32>
    %72 = vector.extract_strided_slice %71 {offsets = [0, 0], sizes = [2, 4], strides = [1, 1]} : vector<2x16xf32> to vector<2x4xf32>
    %73 = vector.extract_strided_slice %71 {offsets = [0, 4], sizes = [2, 4], strides = [1, 1]} : vector<2x16xf32> to vector<2x4xf32>
    %74 = vector.extract_strided_slice %71 {offsets = [0, 8], sizes = [2, 4], strides = [1, 1]} : vector<2x16xf32> to vector<2x4xf32>
    %75 = vector.extract_strided_slice %71 {offsets = [0, 12], sizes = [2, 4], strides = [1, 1]} : vector<2x16xf32> to vector<2x4xf32>
    %76 = arith.mulf %73, %44 : vector<2x4xf32>
    %77 = arith.mulf %72, %75 : vector<2x4xf32>
    %78 = arith.addf %76, %77 : vector<2x4xf32>
    %79 = math.tanh %78 : vector<2x4xf32>
    %80 = arith.mulf %74, %79 : vector<2x4xf32>
    %81 = vector.extract_strided_slice %0 {offsets = [0, 2], sizes = [2, 1], strides = [1, 1]} : vector<2x16xf32> to vector<2x1xf32>
    %82 = vector.broadcast %81 : vector<2x1xf32> to vector<2x16xf32>
    %83 = arith.mulf %82, %3 : vector<2x16xf32>
    %84 = vector.extract_strided_slice %0 {offsets = [0, 3], sizes = [2, 1], strides = [1, 1]} : vector<2x16xf32> to vector<2x1xf32>
    %85 = vector.broadcast %84 : vector<2x1xf32> to vector<2x16xf32>
    %86 = arith.mulf %85, %6 : vector<2x16xf32>
    %87 = arith.addf %83, %86 : vector<2x16xf32>
    %88 = arith.addf %87, %21 : vector<2x16xf32>
    %89 = vector.extract_strided_slice %80 {offsets = [0, 0], sizes = [2, 1], strides = [1, 1]} : vector<2x4xf32> to vector<2x1xf32>
    %90 = vector.broadcast %89 : vector<2x1xf32> to vector<2x16xf32>
    %91 = arith.mulf %90, %9 : vector<2x16xf32>
    %92 = vector.extract_strided_slice %80 {offsets = [0, 1], sizes = [2, 1], strides = [1, 1]} : vector<2x4xf32> to vector<2x1xf32>
    %93 = vector.broadcast %92 : vector<2x1xf32> to vector<2x16xf32>
    %94 = arith.mulf %93, %12 : vector<2x16xf32>
    %95 = vector.extract_strided_slice %80 {offsets = [0, 2], sizes = [2, 1], strides = [1, 1]} : vector<2x4xf32> to vector<2x1xf32>
    %96 = vector.broadcast %95 : vector<2x1xf32> to vector<2x16xf32>
    %97 = arith.mulf %96, %15 : vector<2x16xf32>
    %98 = vector.extract_strided_slice %80 {offsets = [0, 3], sizes = [2, 1], strides = [1, 1]} : vector<2x4xf32> to vector<2x1xf32>
    %99 = vector.broadcast %98 : vector<2x1xf32> to vector<2x16xf32>
    %100 = arith.mulf %99, %18 : vector<2x16xf32>
    %101 = arith.addf %91, %94 : vector<2x16xf32>
    %102 = arith.addf %97, %100 : vector<2x16xf32>
    %103 = arith.addf %101, %102 : vector<2x16xf32>
    %104 = arith.addf %88, %103 : vector<2x16xf32>
    %105 = math.tanh %104 : vector<2x16xf32>
    %106 = arith.mulf %105, %24 : vector<2x16xf32>
    %107 = arith.addf %106, %27 : vector<2x16xf32>
    %108 = vector.extract_strided_slice %107 {offsets = [0, 0], sizes = [2, 4], strides = [1, 1]} : vector<2x16xf32> to vector<2x4xf32>
    %109 = vector.extract_strided_slice %107 {offsets = [0, 4], sizes = [2, 4], strides = [1, 1]} : vector<2x16xf32> to vector<2x4xf32>
    %110 = vector.extract_strided_slice %107 {offsets = [0, 8], sizes = [2, 4], strides = [1, 1]} : vector<2x16xf32> to vector<2x4xf32>
    %111 = vector.extract_strided_slice %107 {offsets = [0, 12], sizes = [2, 4], strides = [1, 1]} : vector<2x16xf32> to vector<2x4xf32>
    %112 = arith.mulf %109, %78 : vector<2x4xf32>
    %113 = arith.mulf %108, %111 : vector<2x4xf32>
    %114 = arith.addf %112, %113 : vector<2x4xf32>
    %115 = math.tanh %114 : vector<2x4xf32>
    %116 = arith.mulf %110, %115 : vector<2x4xf32>
    %117 = vector.extract_strided_slice %0 {offsets = [0, 4], sizes = [2, 1], strides = [1, 1]} : vector<2x16xf32> to vector<2x1xf32>
    %118 = vector.broadcast %117 : vector<2x1xf32> to vector<2x16xf32>
    %119 = arith.mulf %118, %3 : vector<2x16xf32>
    %120 = vector.extract_strided_slice %0 {offsets = [0, 5], sizes = [2, 1], strides = [1, 1]} : vector<2x16xf32> to vector<2x1xf32>
    %121 = vector.broadcast %120 : vector<2x1xf32> to vector<2x16xf32>
    %122 = arith.mulf %121, %6 : vector<2x16xf32>
    %123 = arith.addf %119, %122 : vector<2x16xf32>
    %124 = arith.addf %123, %21 : vector<2x16xf32>
    %125 = vector.extract_strided_slice %116 {offsets = [0, 0], sizes = [2, 1], strides = [1, 1]} : vector<2x4xf32> to vector<2x1xf32>
    %126 = vector.broadcast %125 : vector<2x1xf32> to vector<2x16xf32>
    %127 = arith.mulf %126, %9 : vector<2x16xf32>
    %128 = vector.extract_strided_slice %116 {offsets = [0, 1], sizes = [2, 1], strides = [1, 1]} : vector<2x4xf32> to vector<2x1xf32>
    %129 = vector.broadcast %128 : vector<2x1xf32> to vector<2x16xf32>
    %130 = arith.mulf %129, %12 : vector<2x16xf32>
    %131 = vector.extract_strided_slice %116 {offsets = [0, 2], sizes = [2, 1], strides = [1, 1]} : vector<2x4xf32> to vector<2x1xf32>
    %132 = vector.broadcast %131 : vector<2x1xf32> to vector<2x16xf32>
    %133 = arith.mulf %132, %15 : vector<2x16xf32>
    %134 = vector.extract_strided_slice %116 {offsets = [0, 3], sizes = [2, 1], strides = [1, 1]} : vector<2x4xf32> to vector<2x1xf32>
    %135 = vector.broadcast %134 : vector<2x1xf32> to vector<2x16xf32>
    %136 = arith.mulf %135, %18 : vector<2x16xf32>
    %137 = arith.addf %127, %130 : vector<2x16xf32>
    %138 = arith.addf %133, %136 : vector<2x16xf32>
    %139 = arith.addf %137, %138 : vector<2x16xf32>
    %140 = arith.addf %124, %139 : vector<2x16xf32>
    %141 = math.tanh %140 : vector<2x16xf32>
    %142 = arith.mulf %141, %24 : vector<2x16xf32>
    %143 = arith.addf %142, %27 : vector<2x16xf32>
    %144 = vector.extract_strided_slice %143 {offsets = [0, 0], sizes = [2, 4], strides = [1, 1]} : vector<2x16xf32> to vector<2x4xf32>
    %145 = vector.extract_strided_slice %143 {offsets = [0, 4], sizes = [2, 4], strides = [1, 1]} : vector<2x16xf32> to vector<2x4xf32>
    %146 = vector.extract_strided_slice %143 {offsets = [0, 8], sizes = [2, 4], strides = [1, 1]} : vector<2x16xf32> to vector<2x4xf32>
    %147 = vector.extract_strided_slice %143 {offsets = [0, 12], sizes = [2, 4], strides = [1, 1]} : vector<2x16xf32> to vector<2x4xf32>
    %148 = arith.mulf %145, %114 : vector<2x4xf32>
    %149 = arith.mulf %144, %147 : vector<2x4xf32>
    %150 = arith.addf %148, %149 : vector<2x4xf32>
    %151 = math.tanh %150 : vector<2x4xf32>
    %152 = arith.mulf %146, %151 : vector<2x4xf32>
    %153 = vector.extract_strided_slice %0 {offsets = [0, 6], sizes = [2, 1], strides = [1, 1]} : vector<2x16xf32> to vector<2x1xf32>
    %154 = vector.broadcast %153 : vector<2x1xf32> to vector<2x16xf32>
    %155 = arith.mulf %154, %3 : vector<2x16xf32>
    %156 = vector.extract_strided_slice %0 {offsets = [0, 7], sizes = [2, 1], strides = [1, 1]} : vector<2x16xf32> to vector<2x1xf32>
    %157 = vector.broadcast %156 : vector<2x1xf32> to vector<2x16xf32>
    %158 = arith.mulf %157, %6 : vector<2x16xf32>
    %159 = arith.addf %155, %158 : vector<2x16xf32>
    %160 = arith.addf %159, %21 : vector<2x16xf32>
    %161 = vector.extract_strided_slice %152 {offsets = [0, 0], sizes = [2, 1], strides = [1, 1]} : vector<2x4xf32> to vector<2x1xf32>
    %162 = vector.broadcast %161 : vector<2x1xf32> to vector<2x16xf32>
    %163 = arith.mulf %162, %9 : vector<2x16xf32>
    %164 = vector.extract_strided_slice %152 {offsets = [0, 1], sizes = [2, 1], strides = [1, 1]} : vector<2x4xf32> to vector<2x1xf32>
    %165 = vector.broadcast %164 : vector<2x1xf32> to vector<2x16xf32>
    %166 = arith.mulf %165, %12 : vector<2x16xf32>
    %167 = vector.extract_strided_slice %152 {offsets = [0, 2], sizes = [2, 1], strides = [1, 1]} : vector<2x4xf32> to vector<2x1xf32>
    %168 = vector.broadcast %167 : vector<2x1xf32> to vector<2x16xf32>
    %169 = arith.mulf %168, %15 : vector<2x16xf32>
    %170 = vector.extract_strided_slice %152 {offsets = [0, 3], sizes = [2, 1], strides = [1, 1]} : vector<2x4xf32> to vector<2x1xf32>
    %171 = vector.broadcast %170 : vector<2x1xf32> to vector<2x16xf32>
    %172 = arith.mulf %171, %18 : vector<2x16xf32>
    %173 = arith.addf %163, %166 : vector<2x16xf32>
    %174 = arith.addf %169, %172 : vector<2x16xf32>
    %175 = arith.addf %173, %174 : vector<2x16xf32>
    %176 = arith.addf %160, %175 : vector<2x16xf32>
    %177 = math.tanh %176 : vector<2x16xf32>
    %178 = arith.mulf %177, %24 : vector<2x16xf32>
    %179 = arith.addf %178, %27 : vector<2x16xf32>
    %180 = vector.extract_strided_slice %179 {offsets = [0, 0], sizes = [2, 4], strides = [1, 1]} : vector<2x16xf32> to vector<2x4xf32>
    %181 = vector.extract_strided_slice %179 {offsets = [0, 4], sizes = [2, 4], strides = [1, 1]} : vector<2x16xf32> to vector<2x4xf32>
    %182 = vector.extract_strided_slice %179 {offsets = [0, 8], sizes = [2, 4], strides = [1, 1]} : vector<2x16xf32> to vector<2x4xf32>
    %183 = vector.extract_strided_slice %179 {offsets = [0, 12], sizes = [2, 4], strides = [1, 1]} : vector<2x16xf32> to vector<2x4xf32>
    %184 = arith.mulf %181, %150 : vector<2x4xf32>
    %185 = arith.mulf %180, %183 : vector<2x4xf32>
    %186 = arith.addf %184, %185 : vector<2x4xf32>
    %187 = math.tanh %186 : vector<2x4xf32>
    %188 = arith.mulf %182, %187 : vector<2x4xf32>
    %189 = vector.extract_strided_slice %0 {offsets = [0, 8], sizes = [2, 1], strides = [1, 1]} : vector<2x16xf32> to vector<2x1xf32>
    %190 = vector.broadcast %189 : vector<2x1xf32> to vector<2x16xf32>
    %191 = arith.mulf %190, %3 : vector<2x16xf32>
    %192 = vector.extract_strided_slice %0 {offsets = [0, 9], sizes = [2, 1], strides = [1, 1]} : vector<2x16xf32> to vector<2x1xf32>
    %193 = vector.broadcast %192 : vector<2x1xf32> to vector<2x16xf32>
    %194 = arith.mulf %193, %6 : vector<2x16xf32>
    %195 = arith.addf %191, %194 : vector<2x16xf32>
    %196 = arith.addf %195, %21 : vector<2x16xf32>
    %197 = vector.extract_strided_slice %188 {offsets = [0, 0], sizes = [2, 1], strides = [1, 1]} : vector<2x4xf32> to vector<2x1xf32>
    %198 = vector.broadcast %197 : vector<2x1xf32> to vector<2x16xf32>
    %199 = arith.mulf %198, %9 : vector<2x16xf32>
    %200 = vector.extract_strided_slice %188 {offsets = [0, 1], sizes = [2, 1], strides = [1, 1]} : vector<2x4xf32> to vector<2x1xf32>
    %201 = vector.broadcast %200 : vector<2x1xf32> to vector<2x16xf32>
    %202 = arith.mulf %201, %12 : vector<2x16xf32>
    %203 = vector.extract_strided_slice %188 {offsets = [0, 2], sizes = [2, 1], strides = [1, 1]} : vector<2x4xf32> to vector<2x1xf32>
    %204 = vector.broadcast %203 : vector<2x1xf32> to vector<2x16xf32>
    %205 = arith.mulf %204, %15 : vector<2x16xf32>
    %206 = vector.extract_strided_slice %188 {offsets = [0, 3], sizes = [2, 1], strides = [1, 1]} : vector<2x4xf32> to vector<2x1xf32>
    %207 = vector.broadcast %206 : vector<2x1xf32> to vector<2x16xf32>
    %208 = arith.mulf %207, %18 : vector<2x16xf32>
    %209 = arith.addf %199, %202 : vector<2x16xf32>
    %210 = arith.addf %205, %208 : vector<2x16xf32>
    %211 = arith.addf %209, %210 : vector<2x16xf32>
    %212 = arith.addf %196, %211 : vector<2x16xf32>
    %213 = math.tanh %212 : vector<2x16xf32>
    %214 = arith.mulf %213, %24 : vector<2x16xf32>
    %215 = arith.addf %214, %27 : vector<2x16xf32>
    %216 = vector.extract_strided_slice %215 {offsets = [0, 0], sizes = [2, 4], strides = [1, 1]} : vector<2x16xf32> to vector<2x4xf32>
    %217 = vector.extract_strided_slice %215 {offsets = [0, 4], sizes = [2, 4], strides = [1, 1]} : vector<2x16xf32> to vector<2x4xf32>
    %218 = vector.extract_strided_slice %215 {offsets = [0, 8], sizes = [2, 4], strides = [1, 1]} : vector<2x16xf32> to vector<2x4xf32>
    %219 = vector.extract_strided_slice %215 {offsets = [0, 12], sizes = [2, 4], strides = [1, 1]} : vector<2x16xf32> to vector<2x4xf32>
    %220 = arith.mulf %217, %186 : vector<2x4xf32>
    %221 = arith.mulf %216, %219 : vector<2x4xf32>
    %222 = arith.addf %220, %221 : vector<2x4xf32>
    %223 = math.tanh %222 : vector<2x4xf32>
    %224 = arith.mulf %218, %223 : vector<2x4xf32>
    %225 = vector.extract_strided_slice %0 {offsets = [0, 10], sizes = [2, 1], strides = [1, 1]} : vector<2x16xf32> to vector<2x1xf32>
    %226 = vector.broadcast %225 : vector<2x1xf32> to vector<2x16xf32>
    %227 = arith.mulf %226, %3 : vector<2x16xf32>
    %228 = vector.extract_strided_slice %0 {offsets = [0, 11], sizes = [2, 1], strides = [1, 1]} : vector<2x16xf32> to vector<2x1xf32>
    %229 = vector.broadcast %228 : vector<2x1xf32> to vector<2x16xf32>
    %230 = arith.mulf %229, %6 : vector<2x16xf32>
    %231 = arith.addf %227, %230 : vector<2x16xf32>
    %232 = arith.addf %231, %21 : vector<2x16xf32>
    %233 = vector.extract_strided_slice %224 {offsets = [0, 0], sizes = [2, 1], strides = [1, 1]} : vector<2x4xf32> to vector<2x1xf32>
    %234 = vector.broadcast %233 : vector<2x1xf32> to vector<2x16xf32>
    %235 = arith.mulf %234, %9 : vector<2x16xf32>
    %236 = vector.extract_strided_slice %224 {offsets = [0, 1], sizes = [2, 1], strides = [1, 1]} : vector<2x4xf32> to vector<2x1xf32>
    %237 = vector.broadcast %236 : vector<2x1xf32> to vector<2x16xf32>
    %238 = arith.mulf %237, %12 : vector<2x16xf32>
    %239 = vector.extract_strided_slice %224 {offsets = [0, 2], sizes = [2, 1], strides = [1, 1]} : vector<2x4xf32> to vector<2x1xf32>
    %240 = vector.broadcast %239 : vector<2x1xf32> to vector<2x16xf32>
    %241 = arith.mulf %240, %15 : vector<2x16xf32>
    %242 = vector.extract_strided_slice %224 {offsets = [0, 3], sizes = [2, 1], strides = [1, 1]} : vector<2x4xf32> to vector<2x1xf32>
    %243 = vector.broadcast %242 : vector<2x1xf32> to vector<2x16xf32>
    %244 = arith.mulf %243, %18 : vector<2x16xf32>
    %245 = arith.addf %235, %238 : vector<2x16xf32>
    %246 = arith.addf %241, %244 : vector<2x16xf32>
    %247 = arith.addf %245, %246 : vector<2x16xf32>
    %248 = arith.addf %232, %247 : vector<2x16xf32>
    %249 = math.tanh %248 : vector<2x16xf32>
    %250 = arith.mulf %249, %24 : vector<2x16xf32>
    %251 = arith.addf %250, %27 : vector<2x16xf32>
    %252 = vector.extract_strided_slice %251 {offsets = [0, 0], sizes = [2, 4], strides = [1, 1]} : vector<2x16xf32> to vector<2x4xf32>
    %253 = vector.extract_strided_slice %251 {offsets = [0, 4], sizes = [2, 4], strides = [1, 1]} : vector<2x16xf32> to vector<2x4xf32>
    %254 = vector.extract_strided_slice %251 {offsets = [0, 8], sizes = [2, 4], strides = [1, 1]} : vector<2x16xf32> to vector<2x4xf32>
    %255 = vector.extract_strided_slice %251 {offsets = [0, 12], sizes = [2, 4], strides = [1, 1]} : vector<2x16xf32> to vector<2x4xf32>
    %256 = arith.mulf %253, %222 : vector<2x4xf32>
    %257 = arith.mulf %252, %255 : vector<2x4xf32>
    %258 = arith.addf %256, %257 : vector<2x4xf32>
    %259 = math.tanh %258 : vector<2x4xf32>
    %260 = arith.mulf %254, %259 : vector<2x4xf32>
    %261 = vector.extract_strided_slice %0 {offsets = [0, 12], sizes = [2, 1], strides = [1, 1]} : vector<2x16xf32> to vector<2x1xf32>
    %262 = vector.broadcast %261 : vector<2x1xf32> to vector<2x16xf32>
    %263 = arith.mulf %262, %3 : vector<2x16xf32>
    %264 = vector.extract_strided_slice %0 {offsets = [0, 13], sizes = [2, 1], strides = [1, 1]} : vector<2x16xf32> to vector<2x1xf32>
    %265 = vector.broadcast %264 : vector<2x1xf32> to vector<2x16xf32>
    %266 = arith.mulf %265, %6 : vector<2x16xf32>
    %267 = arith.addf %263, %266 : vector<2x16xf32>
    %268 = arith.addf %267, %21 : vector<2x16xf32>
    %269 = vector.extract_strided_slice %260 {offsets = [0, 0], sizes = [2, 1], strides = [1, 1]} : vector<2x4xf32> to vector<2x1xf32>
    %270 = vector.broadcast %269 : vector<2x1xf32> to vector<2x16xf32>
    %271 = arith.mulf %270, %9 : vector<2x16xf32>
    %272 = vector.extract_strided_slice %260 {offsets = [0, 1], sizes = [2, 1], strides = [1, 1]} : vector<2x4xf32> to vector<2x1xf32>
    %273 = vector.broadcast %272 : vector<2x1xf32> to vector<2x16xf32>
    %274 = arith.mulf %273, %12 : vector<2x16xf32>
    %275 = vector.extract_strided_slice %260 {offsets = [0, 2], sizes = [2, 1], strides = [1, 1]} : vector<2x4xf32> to vector<2x1xf32>
    %276 = vector.broadcast %275 : vector<2x1xf32> to vector<2x16xf32>
    %277 = arith.mulf %276, %15 : vector<2x16xf32>
    %278 = vector.extract_strided_slice %260 {offsets = [0, 3], sizes = [2, 1], strides = [1, 1]} : vector<2x4xf32> to vector<2x1xf32>
    %279 = vector.broadcast %278 : vector<2x1xf32> to vector<2x16xf32>
    %280 = arith.mulf %279, %18 : vector<2x16xf32>
    %281 = arith.addf %271, %274 : vector<2x16xf32>
    %282 = arith.addf %277, %280 : vector<2x16xf32>
    %283 = arith.addf %281, %282 : vector<2x16xf32>
    %284 = arith.addf %268, %283 : vector<2x16xf32>
    %285 = math.tanh %284 : vector<2x16xf32>
    %286 = arith.mulf %285, %24 : vector<2x16xf32>
    %287 = arith.addf %286, %27 : vector<2x16xf32>
    %288 = vector.extract_strided_slice %287 {offsets = [0, 0], sizes = [2, 4], strides = [1, 1]} : vector<2x16xf32> to vector<2x4xf32>
    %289 = vector.extract_strided_slice %287 {offsets = [0, 4], sizes = [2, 4], strides = [1, 1]} : vector<2x16xf32> to vector<2x4xf32>
    %290 = vector.extract_strided_slice %287 {offsets = [0, 8], sizes = [2, 4], strides = [1, 1]} : vector<2x16xf32> to vector<2x4xf32>
    %291 = vector.extract_strided_slice %287 {offsets = [0, 12], sizes = [2, 4], strides = [1, 1]} : vector<2x16xf32> to vector<2x4xf32>
    %292 = arith.mulf %289, %258 : vector<2x4xf32>
    %293 = arith.mulf %288, %291 : vector<2x4xf32>
    %294 = arith.addf %292, %293 : vector<2x4xf32>
    %295 = math.tanh %294 : vector<2x4xf32>
    %296 = arith.mulf %290, %295 : vector<2x4xf32>
    %297 = vector.extract_strided_slice %0 {offsets = [0, 14], sizes = [2, 1], strides = [1, 1]} : vector<2x16xf32> to vector<2x1xf32>
    %298 = vector.broadcast %297 : vector<2x1xf32> to vector<2x16xf32>
    %299 = arith.mulf %298, %3 : vector<2x16xf32>
    %300 = vector.extract_strided_slice %0 {offsets = [0, 15], sizes = [2, 1], strides = [1, 1]} : vector<2x16xf32> to vector<2x1xf32>
    %301 = vector.broadcast %300 : vector<2x1xf32> to vector<2x16xf32>
    %302 = arith.mulf %301, %6 : vector<2x16xf32>
    %303 = arith.addf %299, %302 : vector<2x16xf32>
    %304 = arith.addf %303, %21 : vector<2x16xf32>
    %305 = vector.extract_strided_slice %296 {offsets = [0, 0], sizes = [2, 1], strides = [1, 1]} : vector<2x4xf32> to vector<2x1xf32>
    %306 = vector.broadcast %305 : vector<2x1xf32> to vector<2x16xf32>
    %307 = arith.mulf %306, %9 : vector<2x16xf32>
    %308 = vector.extract_strided_slice %296 {offsets = [0, 1], sizes = [2, 1], strides = [1, 1]} : vector<2x4xf32> to vector<2x1xf32>
    %309 = vector.broadcast %308 : vector<2x1xf32> to vector<2x16xf32>
    %310 = arith.mulf %309, %12 : vector<2x16xf32>
    %311 = vector.extract_strided_slice %296 {offsets = [0, 2], sizes = [2, 1], strides = [1, 1]} : vector<2x4xf32> to vector<2x1xf32>
    %312 = vector.broadcast %311 : vector<2x1xf32> to vector<2x16xf32>
    %313 = arith.mulf %312, %15 : vector<2x16xf32>
    %314 = vector.extract_strided_slice %296 {offsets = [0, 3], sizes = [2, 1], strides = [1, 1]} : vector<2x4xf32> to vector<2x1xf32>
    %315 = vector.broadcast %314 : vector<2x1xf32> to vector<2x16xf32>
    %316 = arith.mulf %315, %18 : vector<2x16xf32>
    %317 = arith.addf %307, %310 : vector<2x16xf32>
    %318 = arith.addf %313, %316 : vector<2x16xf32>
    %319 = arith.addf %317, %318 : vector<2x16xf32>
    %320 = arith.addf %304, %319 : vector<2x16xf32>
    %321 = math.tanh %320 : vector<2x16xf32>
    %322 = arith.mulf %321, %24 : vector<2x16xf32>
    %323 = arith.addf %322, %27 : vector<2x16xf32>
    %324 = vector.extract_strided_slice %323 {offsets = [0, 0], sizes = [2, 4], strides = [1, 1]} : vector<2x16xf32> to vector<2x4xf32>
    %325 = vector.extract_strided_slice %323 {offsets = [0, 4], sizes = [2, 4], strides = [1, 1]} : vector<2x16xf32> to vector<2x4xf32>
    %326 = vector.extract_strided_slice %323 {offsets = [0, 8], sizes = [2, 4], strides = [1, 1]} : vector<2x16xf32> to vector<2x4xf32>
    %327 = vector.extract_strided_slice %323 {offsets = [0, 12], sizes = [2, 4], strides = [1, 1]} : vector<2x16xf32> to vector<2x4xf32>
    %328 = arith.mulf %325, %294 : vector<2x4xf32>
    %329 = arith.mulf %324, %327 : vector<2x4xf32>
    %330 = arith.addf %328, %329 : vector<2x4xf32>
    %331 = math.tanh %330 : vector<2x4xf32>
    %332 = arith.mulf %326, %331 : vector<2x4xf32>
    %333 = vector.extract_strided_slice %332 {offsets = [0, 0], sizes = [2, 1], strides = [1, 1]} : vector<2x4xf32> to vector<2x1xf32>
    %334 = vector.broadcast %333 : vector<2x1xf32> to vector<2x128xf32>
    %335 = arith.mulf %334, %30 : vector<2x128xf32>
    %336 = vector.extract_strided_slice %332 {offsets = [0, 1], sizes = [2, 1], strides = [1, 1]} : vector<2x4xf32> to vector<2x1xf32>
    %337 = vector.broadcast %336 : vector<2x1xf32> to vector<2x128xf32>
    %338 = arith.mulf %337, %33 : vector<2x128xf32>
    %339 = vector.extract_strided_slice %332 {offsets = [0, 2], sizes = [2, 1], strides = [1, 1]} : vector<2x4xf32> to vector<2x1xf32>
    %340 = vector.broadcast %339 : vector<2x1xf32> to vector<2x128xf32>
    %341 = arith.mulf %340, %36 : vector<2x128xf32>
    %342 = vector.extract_strided_slice %332 {offsets = [0, 3], sizes = [2, 1], strides = [1, 1]} : vector<2x4xf32> to vector<2x1xf32>
    %343 = vector.broadcast %342 : vector<2x1xf32> to vector<2x128xf32>
    %344 = arith.mulf %343, %39 : vector<2x128xf32>
    %345 = arith.addf %335, %338 : vector<2x128xf32>
    %346 = arith.addf %341, %344 : vector<2x128xf32>
    %347 = arith.addf %345, %346 : vector<2x128xf32>
    %348 = arith.addf %347, %42 : vector<2x128xf32>
    %c0_17 = arith.constant 0 : index
    %c0_18 = arith.constant 0 : index
    %349 = vector.load %arg2[%c0_17, %c0_18] : memref<2x128xf32, #tpu.memory_space<vmem>>, vector<2x128xf32>
    tpu.vector_store %arg2[%c0_17, %c0_18], %348 {strides = array<i32>} : memref<2x128xf32, #tpu.memory_space<vmem>>, vector<2x128xf32>,
    return
  }
}

</mosaic_0001>

<bundles_post_ra>
// kernel: rnn_stock_forward.1
= control target key start
LH: loop header
LB: loop body
LE: loop exit
PB: predicated region body
PF: predicated region fallthrough
CT: control target
= control target key end

     0   :  { %v694_v1 = vmov 0   ;;  %s947_s0 = inlined_call_operand.vmem [shape: f32[2,16], index: 0, kind: input, shape index: {}]   ;;  %s948_s1 = inlined_call_operand.vmem [shape: f32[14,128], index: 1, kind: input, shape index: {}]   ;;  %s949_s2 = inlined_call_operand.hbm [shape: f32[2,128], index: 2, kind: output, shape index: {}]  }
   0x1   :  { %v731_v0 = vld [vmem:[%s947_s0] sm:$0x3]  ;;  %596 = vset.pattern.permute.xlu0 %v694_v1 }
   0x2   :  { %7 = vsyncpa [#allocation3], 0  ;;  %85 = vperm.xlu0 %596, %v731_v0   ;;  %v695_v2 = vmov 1   ;;  %v738_v3 = vld [vmem:[%s948_s1 + $0x2] ss:$0 sm:$0xff]  ;;  %s696_s28 = smov 116  }
   0x3   :  { %v743_v4 = vld [vmem:[%s948_s1 + $0x3] ss:$0 sm:$0xff]  ;;  %v748_v5 = vld [vmem:[%s948_s1 + $0x4] ss:$0 sm:$0xff]  ;;  %v753_v6 = vld [vmem:[%s948_s1 + $0x5] ss:$0 sm:$0xff] }
   0x4   :  { %v96_v8 = vmul.f32 0.0, %v738_v3  ;;  %v97_v9 = vmul.f32 0.0, %v743_v4  ;;  %v98_v10 = vmul.f32 0.0, %v748_v5  ;;  %v99_v11 = vmul.f32 0.0, %v753_v6  ;;  %v762_v12 = vld [vmem:[%s948_s1] ss:$0 sm:$0xff] }
   0x5   :  { %v767_v13 = vld [vmem:[%s948_s1 + $0x1] ss:$0 sm:$0xff]  ;;  %v774_v19 = vld [vmem:[%s948_s1 + $0x6] ss:$0 sm:$0xff]  ;;  %v780_v24 = vld [vmem:[%s948_s1 + $0x7] ss:$0 sm:$0xff] }
   0x6   :  { %597 = vset.pattern.permute.xlu0 %v695_v2  ;;  %v100_v14 = vadd.f32 %v97_v9, %v96_v8  ;;  %v101_v15 = vadd.f32 %v99_v11, %v98_v10  ;;  %v785_v26 = vld [vmem:[%s948_s1 + $0x8] ss:$0 sm:$0xff]  ;;  %s697_s29 = smov 4   ;;  %v698_v31 = vmov 3   ;;  %v699_v32 = vmov 2   ;;  %s712_s12 = smov [#allocation2]  }
   0x7   :  { %90 = vperm.xlu0 %597, %v731_v0   ;;  %599 = vset.pattern.permute.xlu1 %v698_v31  ;;  %v700_v36 = vmov 9   ;;  %v701_v38 = vmov 8   ;;  %v702_v41 = vmov 10   ;;  %v703_v42 = vmov 11   ;;  %s555_s13 = sshll.u32 %s712_s12, 4  ;;  %s556_s13 = int_to_ptr.vmem [resolvable:$true] %s555_s13 }
   0x8   :  { %v102_v20 = vadd.f32 %v101_v15, %v100_v14  ;;  %v705_v8 = vmov 4   ;;  %s670_s14 = scalar_lea.vmem %s556_s13, 32  ;;  %p675_p1 = scmp.lt.s32.totalorder %s556_s13, %s556_s13 }
   0x9   :  { %p671_p0 = scmp.ne.s32.totalorder %s556_s13, %s670_s14  ;;  %p676_p2 = scmp.lt.s32.totalorder %s670_s14, %s670_s14 }
   0xb   :  { %598 = vset.pattern.permute.xlu0 %v699_v32  ;;  %p677_p3 = por %p676_p2, %p675_p1 }
   0xc   :  { %125 = vperm.xlu0 %598, %v731_v0  }
   0xd   :  { %p678_p4 = pnand %p677_p3, %p671_p0 }
  0x10   :  { %601 = vset.pattern.permute.xlu0 %v700_v36 }
  0x81   :  { %v86_v7 = vpop.permute.xlu0 %85 }
  0x82   :  { %v88_v17 = vmul.f32 %v762_v12, %v86_v7  ;;  %v704_v7 = vmov 5  }
  0x86   :  { %v91_v16 = vpop.permute.xlu0 %90 }
  0x87   :  { %v93_v18 = vmul.f32 %v767_v13, %v91_v16 }
  0x89   :  { %v94_v21 = vadd.f32 %v93_v18, %v88_v17 }
  0x8b   :  { %v95_v22 = vadd.f32 %v774_v19, %v94_v21  ;;  %v126_v44 = vpop.permute.xlu0 %125 }
  0x8c   :  { %v128_v49 = vmul.f32 %v762_v12, %v126_v44 }
  0x8d   :  { %v103_v23 = vadd.f32 %v102_v20, %v95_v22 }
  0x8f   :  { %638 = vtanh.f32 %v103_v23 }
  0x99   :  { %v639_v25 = vpop.eup %638 }
  0x9a   :  { %v105_v27 = vmul.f32 %v639_v25, %v780_v24 }
  0x9c   :  { %v106_v28 = vadd.f32 %v785_v26, %v105_v27 }
  0x9e   :  { %109 = vrot.lane.b32.xlu1 %v106_v28, %s696_s28  ;;  %v107_v33 = vmul.f32 0.0, %v106_v28 }
 0x110   :  { %v110_v29 = vpop.permute.xlu1 %109 }
 0x111   :  { %v112_v30 = vmul.f32 %v110_v29, %v106_v28 }
 0x113   :  { %114 = vrot.lane.b32.xlu1 %v112_v30, %s697_s29 }
 0x185   :  { %v115_v34 = vpop.permute.xlu1 %114 }
 0x186   :  { %v117_v35 = vadd.f32 %v115_v34, %v107_v33 }
 0x188   :  { %640 = vtanh.f32 %v117_v35 }
 0x192   :  { %v641_v37 = vpop.eup %640 }
 0x193   :  { %120 = vrot.lane.b32.xlu1 %v641_v37, %s697_s29 }
 0x197   :  { %130 = vperm.xlu1 %599, %v731_v0  }
 0x19b   :  { %600 = vset.pattern.permute.xlu1 %v701_v38 }
 0x205   :  { %v121_v39 = vpop.permute.xlu1 %120 }
 0x206   :  { %v123_v40 = vmul.f32 %v121_v39, %v106_v28 }
 0x208   :  { %143 = vperm.xlu0 %601, %v123_v40   ;;  %138 = vperm.xlu1 %600, %v123_v40  }
 0x20c   :  { %602 = vset.pattern.permute.xlu1 %v702_v41  ;;  %605 = vset.pattern.permute.xlu0 %v704_v7 }
 0x20d   :  { %148 = vperm.xlu1 %602, %v123_v40  }
 0x211   :  { %603 = vset.pattern.permute.xlu1 %v703_v42 }
 0x212   :  { %153 = vperm.xlu1 %603, %v123_v40  }
 0x216   :  { %v131_v43 = vpop.permute.xlu1 %130  ;;  %604 = vset.pattern.permute.xlu1 %v705_v8 }
 0x217   :  { %v133_v48 = vmul.f32 %v767_v13, %v131_v43 }
 0x219   :  { %v134_v53 = vadd.f32 %v133_v48, %v128_v49  ;;  %v707_v48 = vmov 7  }
 0x21b   :  { %v135_v58 = vadd.f32 %v774_v19, %v134_v53 }
 0x287   :  { %v139_v45 = vpop.permute.xlu1 %138  ;;  %v144_v47 = vpop.permute.xlu0 %143 }
 0x288   :  { %v141_v50 = vmul.f32 %v738_v3, %v139_v45  ;;  %v146_v51 = vmul.f32 %v743_v4, %v144_v47  ;;  %v706_v47 = vmov 6  }
 0x28a   :  { %v157_v56 = vadd.f32 %v146_v51, %v141_v50 }
 0x28c   :  { %v149_v46 = vpop.permute.xlu1 %148 }
 0x28d   :  { %v151_v54 = vmul.f32 %v748_v5, %v149_v46 }
 0x291   :  { %v154_v52 = vpop.permute.xlu1 %153 }
 0x292   :  { %v156_v55 = vmul.f32 %v753_v6, %v154_v52 }
 0x294   :  { %v158_v57 = vadd.f32 %v156_v55, %v151_v54 }
 0x296   :  { %v159_v59 = vadd.f32 %v158_v57, %v157_v56 }
 0x298   :  { %v160_v60 = vadd.f32 %v159_v59, %v135_v58 }
 0x29a   :  { %642 = vtanh.f32 %v160_v60 }
 0x2a4   :  { %v643_v61 = vpop.eup %642 }
 0x2a5   :  { %v162_v62 = vmul.f32 %v643_v61, %v780_v24 }
 0x2a7   :  { %v163_v63 = vadd.f32 %v785_v26, %v162_v62 }
 0x2a9   :  { %166 = vrot.lane.b32.xlu0 %v163_v63, %s696_s28  ;;  %v164_v9 = vmul.f32 %v163_v63, %v117_v35 }
 0x31b   :  { %v167_v1 = vpop.permute.xlu0 %166 }
 0x31c   :  { %v169_v2 = vmul.f32 %v167_v1, %v163_v63 }
 0x31e   :  { %171 = vrot.lane.b32.xlu1 %v169_v2, %s697_s29 }
 0x322   :  { %182 = vperm.xlu1 %604, %v731_v0  }
 0x326   :  { %606 = vset.pattern.permute.xlu1 %v701_v38 }
 0x390   :  { %v172_v10 = vpop.permute.xlu1 %171 }
 0x391   :  { %v174_v11 = vadd.f32 %v172_v10, %v164_v9 }
 0x393   :  { %644 = vtanh.f32 %v174_v11 }
 0x39d   :  { %v645_v14 = vpop.eup %644 }
 0x39e   :  { %177 = vrot.lane.b32.xlu0 %v645_v14, %s697_s29 }
 0x3a1   :  { %v183_v17 = vpop.permute.xlu1 %182 }
 0x3a2   :  { %187 = vperm.xlu0 %605, %v731_v0   ;;  %v185_v22 = vmul.f32 %v762_v12, %v183_v17 }
 0x3a6   :  { %608 = vset.pattern.permute.xlu0 %v702_v41 }
 0x410   :  { %v178_v15 = vpop.permute.xlu0 %177 }
 0x411   :  { %v180_v16 = vmul.f32 %v178_v15, %v163_v63 }
 0x413   :  { %205 = vperm.xlu0 %608, %v180_v16   ;;  %195 = vperm.xlu1 %606, %v180_v16  }
 0x417   :  { %607 = vset.pattern.permute.xlu1 %v700_v36  ;;  %610 = vset.pattern.permute.xlu0 %v706_v47 }
 0x418   :  { %200 = vperm.xlu1 %607, %v180_v16  }
 0x41c   :  { %609 = vset.pattern.permute.xlu1 %v703_v42 }
 0x41d   :  { %210 = vperm.xlu1 %609, %v180_v16  }
 0x421   :  { %v188_v20 = vpop.permute.xlu0 %187  ;;  %611 = vset.pattern.permute.xlu1 %v707_v48 }
 0x422   :  { %v190_v23 = vmul.f32 %v767_v13, %v188_v20 }
 0x424   :  { %v191_v29 = vadd.f32 %v190_v23, %v185_v22 }
 0x426   :  { %v192_v35 = vadd.f32 %v774_v19, %v191_v29 }
 0x492   :  { %v196_v18 = vpop.permute.xlu1 %195  ;;  %v206_v25 = vpop.permute.xlu0 %205 }
 0x493   :  { %v198_v30 = vmul.f32 %v738_v3, %v196_v18  ;;  %v208_v31 = vmul.f32 %v748_v5, %v206_v25 }
 0x497   :  { %v201_v21 = vpop.permute.xlu1 %200 }
 0x498   :  { %v203_v27 = vmul.f32 %v743_v4, %v201_v21 }
 0x49a   :  { %v214_v33 = vadd.f32 %v203_v27, %v198_v30 }
 0x49c   :  { %v211_v28 = vpop.permute.xlu1 %210 }
 0x49d   :  { %v213_v32 = vmul.f32 %v753_v6, %v211_v28 }
 0x49f   :  { %v215_v34 = vadd.f32 %v213_v32, %v208_v31 }
 0x4a1   :  { %v216_v37 = vadd.f32 %v215_v34, %v214_v33 }
 0x4a3   :  { %v217_v39 = vadd.f32 %v216_v37, %v192_v35 }
 0x4a5   :  { %646 = vtanh.f32 %v217_v39 }
 0x4af   :  { %v647_v40 = vpop.eup %646 }
 0x4b0   :  { %v219_v43 = vmul.f32 %v647_v40, %v780_v24 }
 0x4b2   :  { %v220_v44 = vadd.f32 %v785_v26, %v219_v43 }
 0x4b4   :  { %223 = vrot.lane.b32.xlu1 %v220_v44, %s696_s28  ;;  %v221_v49 = vmul.f32 %v220_v44, %v174_v11 }
 0x526   :  { %v224_v45 = vpop.permute.xlu1 %223 }
 0x527   :  { %v226_v46 = vmul.f32 %v224_v45, %v220_v44 }
 0x529   :  { %228 = vrot.lane.b32.xlu0 %v226_v46, %s697_s29 }
 0x52d   :  { %239 = vperm.xlu0 %610, %v731_v0  }
 0x531   :  { %613 = vset.pattern.permute.xlu0 %v700_v36 }
 0x59b   :  { %v229_v50 = vpop.permute.xlu0 %228 }
 0x59c   :  { %v231_v51 = vadd.f32 %v229_v50, %v221_v49 }
 0x59e   :  { %648 = vtanh.f32 %v231_v51 }
 0x5a8   :  { %v649_v52 = vpop.eup %648 }
 0x5a9   :  { %234 = vrot.lane.b32.xlu1 %v649_v52, %s697_s29 }
 0x5ac   :  { %v240_v56 = vpop.permute.xlu0 %239 }
 0x5ad   :  { %244 = vperm.xlu1 %611, %v731_v0   ;;  %v242_v60 = vmul.f32 %v762_v12, %v240_v56 }
 0x5b1   :  { %612 = vset.pattern.permute.xlu1 %v701_v38 }
 0x61b   :  { %v235_v53 = vpop.permute.xlu1 %234 }
 0x61c   :  { %v237_v54 = vmul.f32 %v235_v53, %v220_v44 }
 0x61e   :  { %257 = vperm.xlu0 %613, %v237_v54   ;;  %252 = vperm.xlu1 %612, %v237_v54  }
 0x622   :  { %614 = vset.pattern.permute.xlu1 %v702_v41 }
 0x623   :  { %262 = vperm.xlu1 %614, %v237_v54  }
 0x627   :  { %615 = vset.pattern.permute.xlu1 %v703_v42 }
 0x628   :  { %267 = vperm.xlu1 %615, %v237_v54  }
 0x62c   :  { %616 = vset.pattern.permute.xlu1 %v701_v38  ;;  %v245_v55 = vpop.permute.xlu1 %244 }
 0x62d   :  { %v247_v61 = vmul.f32 %v767_v13, %v245_v55 }
 0x62f   :  { %v248_v2 = vadd.f32 %v247_v61, %v242_v60 }
 0x631   :  { %v249_v11 = vadd.f32 %v774_v19, %v248_v2 }
 0x69d   :  { %v253_v57 = vpop.permute.xlu1 %252  ;;  %v258_v59 = vpop.permute.xlu0 %257 }
 0x69e   :  { %v260_v62 = vmul.f32 %v743_v4, %v258_v59  ;;  %v255_v63 = vmul.f32 %v738_v3, %v253_v57 }
 0x6a0   :  { %v271_v9 = vadd.f32 %v260_v62, %v255_v63 }
 0x6a2   :  { %v263_v58 = vpop.permute.xlu1 %262 }
 0x6a3   :  { %v265_v7 = vmul.f32 %v748_v5, %v263_v58 }
 0x6a7   :  { %v268_v1 = vpop.permute.xlu1 %267 }
 0x6a8   :  { %v270_v8 = vmul.f32 %v753_v6, %v268_v1 }
 0x6aa   :  { %v272_v10 = vadd.f32 %v270_v8, %v265_v7 }
 0x6ac   :  { %v273_v14 = vadd.f32 %v272_v10, %v271_v9 }
 0x6ae   :  { %v274_v15 = vadd.f32 %v273_v14, %v249_v11 }
 0x6b0   :  { %650 = vtanh.f32 %v274_v15 }
 0x6ba   :  { %v651_v16 = vpop.eup %650 }
 0x6bb   :  { %v276_v17 = vmul.f32 %v651_v16, %v780_v24 }
 0x6bd   :  { %v277_v18 = vadd.f32 %v785_v26, %v276_v17 }
 0x6bf   :  { %280 = vrot.lane.b32.xlu0 %v277_v18, %s696_s28  ;;  %v278_v22 = vmul.f32 %v277_v18, %v231_v51 }
 0x731   :  { %v281_v20 = vpop.permute.xlu0 %280 }
 0x732   :  { %v283_v21 = vmul.f32 %v281_v20, %v277_v18 }
 0x734   :  { %285 = vrot.lane.b32.xlu1 %v283_v21, %s697_s29 }
 0x738   :  { %296 = vperm.xlu1 %616, %v731_v0  }
 0x7a6   :  { %v286_v23 = vpop.permute.xlu1 %285 }
 0x7a7   :  { %v288_v25 = vadd.f32 %v286_v23, %v278_v22 }
 0x7a9   :  { %652 = vtanh.f32 %v288_v25 }
 0x7b3   :  { %v653_v27 = vpop.eup %652 }
 0x7b4   :  { %291 = vrot.lane.b32.xlu0 %v653_v27, %s697_s29 }
 0x7b7   :  { %v297_v30 = vpop.permute.xlu1 %296 }
 0x7b8   :  { %301 = vperm.xlu0 %613, %v731_v0   ;;  %v299_v34 = vmul.f32 %v762_v12, %v297_v30 }
 0x826   :  { %v292_v28 = vpop.permute.xlu0 %291 }
 0x827   :  { %v294_v29 = vmul.f32 %v292_v28, %v277_v18 }
 0x829   :  { %314 = vperm.xlu0 %613, %v294_v29   ;;  %309 = vperm.xlu1 %616, %v294_v29  }
 0x82d   :  { %618 = vset.pattern.permute.xlu0 %v703_v42  ;;  %617 = vset.pattern.permute.xlu1 %v702_v41 }
 0x82e   :  { %324 = vperm.xlu0 %618, %v294_v29   ;;  %319 = vperm.xlu1 %617, %v294_v29  }
 0x837   :  { %v302_v31 = vpop.permute.xlu0 %301 }
 0x838   :  { %v304_v35 = vmul.f32 %v767_v13, %v302_v31 }
 0x83a   :  { %v305_v44 = vadd.f32 %v304_v35, %v299_v34 }
 0x83c   :  { %v306_v49 = vadd.f32 %v774_v19, %v305_v44 }
 0x8a8   :  { %v310_v32 = vpop.permute.xlu1 %309  ;;  %v315_v33 = vpop.permute.xlu0 %314 }
 0x8a9   :  { %v312_v37 = vmul.f32 %v738_v3, %v310_v32  ;;  %v317_v39 = vmul.f32 %v743_v4, %v315_v33  ;;  %v708_v32 = vmov 13   ;;  %v709_v33 = vmov 12  }
 0x8ab   :  { %v328_v47 = vadd.f32 %v317_v39, %v312_v37 }
 0x8ad   :  { %v320_v40 = vpop.permute.xlu1 %319  ;;  %v325_v43 = vpop.permute.xlu0 %324 }
 0x8ae   :  { %v322_v45 = vmul.f32 %v748_v5, %v320_v40  ;;  %v327_v46 = vmul.f32 %v753_v6, %v325_v43 }
 0x8b0   :  { %v329_v48 = vadd.f32 %v327_v46, %v322_v45 }
 0x8b2   :  { %v330_v50 = vadd.f32 %v329_v48, %v328_v47 }
 0x8b4   :  { %v331_v51 = vadd.f32 %v330_v50, %v306_v49 }
 0x8b6   :  { %654 = vtanh.f32 %v331_v51 }
 0x8c0   :  { %v655_v52 = vpop.eup %654 }
 0x8c1   :  { %v333_v53 = vmul.f32 %v655_v52, %v780_v24 }
 0x8c3   :  { %v334_v54 = vadd.f32 %v785_v26, %v333_v53 }
 0x8c5   :  { %337 = vrot.lane.b32.xlu1 %v334_v54, %s696_s28  ;;  %v335_v57 = vmul.f32 %v334_v54, %v288_v25 }
 0x937   :  { %v338_v55 = vpop.permute.xlu1 %337 }
 0x938   :  { %v340_v56 = vmul.f32 %v338_v55, %v334_v54 }
 0x93a   :  { %342 = vrot.lane.b32.xlu1 %v340_v56, %s697_s29 }
 0x93e   :  { %353 = vperm.xlu1 %617, %v731_v0  }
 0x942   :  { %619 = vset.pattern.permute.xlu1 %v701_v38 }
 0x9ac   :  { %v343_v58 = vpop.permute.xlu1 %342 }
 0x9ad   :  { %v345_v59 = vadd.f32 %v343_v58, %v335_v57 }
 0x9af   :  { %656 = vtanh.f32 %v345_v59 }
 0x9b9   :  { %v657_v60 = vpop.eup %656 }
 0x9ba   :  { %348 = vrot.lane.b32.xlu0 %v657_v60, %s697_s29 }
 0x9bd   :  { %v354_v63 = vpop.permute.xlu1 %353 }
 0x9be   :  { %358 = vperm.xlu0 %618, %v731_v0   ;;  %v356_v10 = vmul.f32 %v762_v12, %v354_v63 }
 0x9c2   :  { %620 = vset.pattern.permute.xlu0 %v700_v36 }
 0xa2c   :  { %v349_v61 = vpop.permute.xlu0 %348 }
 0xa2d   :  { %v351_v62 = vmul.f32 %v349_v61, %v334_v54 }
 0xa2f   :  { %371 = vperm.xlu0 %620, %v351_v62   ;;  %366 = vperm.xlu1 %619, %v351_v62  }
 0xa33   :  { %621 = vset.pattern.permute.xlu1 %v702_v41  ;;  %624 = vset.pattern.permute.xlu0 %v708_v32 }
 0xa34   :  { %376 = vperm.xlu1 %621, %v351_v62  }
 0xa38   :  { %622 = vset.pattern.permute.xlu1 %v703_v42 }
 0xa39   :  { %381 = vperm.xlu1 %622, %v351_v62  }
 0xa3d   :  { %v359_v2 = vpop.permute.xlu0 %358  ;;  %623 = vset.pattern.permute.xlu1 %v709_v33 }
 0xa3e   :  { %v361_v9 = vmul.f32 %v767_v13, %v359_v2 }
 0xa40   :  { %v362_v16 = vadd.f32 %v361_v9, %v356_v10  ;;  %v711_v9 = vmov 15  }
 0xa42   :  { %v363_v22 = vadd.f32 %v774_v19, %v362_v16 }
 0xaae   :  { %v367_v1 = vpop.permute.xlu1 %366  ;;  %v372_v8 = vpop.permute.xlu0 %371 }
 0xaaf   :  { %v369_v11 = vmul.f32 %v738_v3, %v367_v1  ;;  %v374_v14 = vmul.f32 %v743_v4, %v372_v8  ;;  %v710_v8 = vmov 14  }
 0xab1   :  { %v385_v20 = vadd.f32 %v374_v14, %v369_v11 }
 0xab3   :  { %v377_v7 = vpop.permute.xlu1 %376 }
 0xab4   :  { %v379_v17 = vmul.f32 %v748_v5, %v377_v7 }
 0xab8   :  { %v382_v15 = vpop.permute.xlu1 %381 }
 0xab9   :  { %v384_v18 = vmul.f32 %v753_v6, %v382_v15 }
 0xabb   :  { %v386_v21 = vadd.f32 %v384_v18, %v379_v17 }
 0xabd   :  { %v387_v23 = vadd.f32 %v386_v21, %v385_v20 }
 0xabf   :  { %v388_v25 = vadd.f32 %v387_v23, %v363_v22 }
 0xac1   :  { %658 = vtanh.f32 %v388_v25 }
 0xacb   :  { %v659_v27 = vpop.eup %658 }
 0xacc   :  { %v390_v28 = vmul.f32 %v659_v27, %v780_v24 }
 0xace   :  { %v391_v29 = vadd.f32 %v785_v26, %v390_v28 }
 0xad0   :  { %394 = vrot.lane.b32.xlu0 %v391_v29, %s696_s28  ;;  %v392_v34 = vmul.f32 %v391_v29, %v345_v59 }
 0xb42   :  { %v395_v30 = vpop.permute.xlu0 %394 }
 0xb43   :  { %v397_v31 = vmul.f32 %v395_v30, %v391_v29 }
 0xb45   :  { %399 = vrot.lane.b32.xlu1 %v397_v31, %s697_s29 }
 0xb49   :  { %410 = vperm.xlu1 %623, %v731_v0  }
 0xb4d   :  { %625 = vset.pattern.permute.xlu1 %v701_v38 }
 0xbb7   :  { %v400_v35 = vpop.permute.xlu1 %399 }
 0xbb8   :  { %v402_v37 = vadd.f32 %v400_v35, %v392_v34 }
 0xbba   :  { %660 = vtanh.f32 %v402_v37 }
 0xbc4   :  { %v661_v39 = vpop.eup %660 }
 0xbc5   :  { %405 = vrot.lane.b32.xlu0 %v661_v39, %s697_s29 }
 0xbc8   :  { %v411_v44 = vpop.permute.xlu1 %410 }
 0xbc9   :  { %415 = vperm.xlu0 %624, %v731_v0   ;;  %v413_v48 = vmul.f32 %v762_v12, %v411_v44  ;;  %v573_v44 = vld [vmem:[%s948_s1 + $0xa] ss:$0 sm:$0xff] }
 0xbcd   :  { %627 = vset.pattern.permute.xlu0 %v702_v41 }
 0xc37   :  { %v406_v40 = vpop.permute.xlu0 %405 }
 0xc38   :  { %v408_v43 = vmul.f32 %v406_v40, %v391_v29 }
 0xc3a   :  { %433 = vperm.xlu0 %627, %v408_v43   ;;  %423 = vperm.xlu1 %625, %v408_v43  }
 0xc3e   :  { %626 = vset.pattern.permute.xlu1 %v700_v36  ;;  %629 = vset.pattern.permute.xlu0 %v710_v8 }
 0xc3f   :  { %428 = vperm.xlu1 %626, %v408_v43  }
 0xc43   :  { %628 = vset.pattern.permute.xlu1 %v703_v42 }
 0xc44   :  { %438 = vperm.xlu1 %628, %v408_v43  }
 0xc48   :  { %v416_v46 = vpop.permute.xlu0 %415  ;;  %630 = vset.pattern.permute.xlu1 %v711_v9 }
 0xc49   :  { %v418_v49 = vmul.f32 %v767_v13, %v416_v46  ;;  %v575_v46 = vld [vmem:[%s948_s1 + $0xc] ss:$0 sm:$0xff] }
 0xc4b   :  { %v419_v53 = vadd.f32 %v418_v49, %v413_v48 }
 0xc4d   :  { %v420_v59 = vadd.f32 %v774_v19, %v419_v53 }
 0xcb9   :  { %v424_v45 = vpop.permute.xlu1 %423  ;;  %v434_v50 = vpop.permute.xlu0 %433 }
 0xcba   :  { %v426_v54 = vmul.f32 %v738_v3, %v424_v45  ;;  %v436_v55 = vmul.f32 %v748_v5, %v434_v50  ;;  %v572_v45 = vld [vmem:[%s948_s1 + $0x9] ss:$0 sm:$0xff] }
 0xcbe   :  { %v429_v47 = vpop.permute.xlu1 %428 }
 0xcbf   :  { %v431_v51 = vmul.f32 %v743_v4, %v429_v47 }
 0xcc1   :  { %v442_v57 = vadd.f32 %v431_v51, %v426_v54  ;;  %v576_v54 = vld [vmem:[%s948_s1 + $0xd] ss:$0 sm:$0xff] }
 0xcc3   :  { %v439_v52 = vpop.permute.xlu1 %438 }
 0xcc4   :  { %v441_v56 = vmul.f32 %v753_v6, %v439_v52 }
 0xcc6   :  { %v443_v58 = vadd.f32 %v441_v56, %v436_v55 }
 0xcc8   :  { %v444_v60 = vadd.f32 %v443_v58, %v442_v57 }
 0xcca   :  { %v445_v61 = vadd.f32 %v444_v60, %v420_v59 }
 0xccc   :  { %662 = vtanh.f32 %v445_v61 }
 0xcd6   :  { %v663_v62 = vpop.eup %662 }
 0xcd7   :  { %v447_v63 = vmul.f32 %v663_v62, %v780_v24 }
 0xcd9   :  { %v448_v1 = vadd.f32 %v785_v26, %v447_v63 }
 0xcdb   :  { %451 = vrot.lane.b32.xlu1 %v448_v1, %s696_s28  ;;  %v449_v10 = vmul.f32 %v448_v1, %v402_v37 }
 0xd4d   :  { %v452_v2 = vpop.permute.xlu1 %451 }
 0xd4e   :  { %v454_v7 = vmul.f32 %v452_v2, %v448_v1 }
 0xd50   :  { %456 = vrot.lane.b32.xlu0 %v454_v7, %s697_s29 }
 0xd54   :  { %467 = vperm.xlu0 %629, %v731_v0  }
 0xd58   :  { %632 = vset.pattern.permute.xlu0 %v700_v36 }
 0xdc2   :  { %v457_v11 = vpop.permute.xlu0 %456 }
 0xdc3   :  { %v459_v14 = vadd.f32 %v457_v11, %v449_v10 }
 0xdc5   :  { %664 = vtanh.f32 %v459_v14 }
 0xdcf   :  { %v665_v15 = vpop.eup %664 }
 0xdd0   :  { %462 = vrot.lane.b32.xlu1 %v665_v15, %s697_s29 }
 0xdd3   :  { %v468_v18 = vpop.permute.xlu0 %467 }
 0xdd4   :  { %472 = vperm.xlu1 %630, %v731_v0   ;;  %v470_v0 = vmul.f32 %v762_v12, %v468_v18 }
 0xdd8   :  { %631 = vset.pattern.permute.xlu1 %v701_v38 }
 0xe42   :  { %v463_v16 = vpop.permute.xlu1 %462 }
 0xe43   :  { %v465_v17 = vmul.f32 %v463_v16, %v448_v1 }
 0xe45   :  { %485 = vperm.xlu0 %632, %v465_v17   ;;  %480 = vperm.xlu1 %631, %v465_v17  }
 0xe49   :  { %633 = vset.pattern.permute.xlu1 %v702_v41 }
 0xe4a   :  { %490 = vperm.xlu1 %633, %v465_v17  }
 0xe4e   :  { %634 = vset.pattern.permute.xlu1 %v703_v42 }
 0xe4f   :  { %495 = vperm.xlu1 %634, %v465_v17  }
 0xe53   :  { %635 = vset.pattern.permute.xlu1 %v701_v38  ;;  %v473_v36 = vpop.permute.xlu1 %472 }
 0xe54   :  { %v475_v23 = vmul.f32 %v767_v13, %v473_v36 }
 0xe56   :  { %v476_v29 = vadd.f32 %v475_v23, %v470_v0 }
 0xe58   :  { %v477_v33 = vadd.f32 %v774_v19, %v476_v29 }
 0xec4   :  { %v481_v20 = vpop.permute.xlu1 %480  ;;  %v486_v22 = vpop.permute.xlu0 %485 }
 0xec5   :  { %v488_v25 = vmul.f32 %v743_v4, %v486_v22  ;;  %v483_v27 = vmul.f32 %v738_v3, %v481_v20 }
 0xec7   :  { %v499_v38 = vadd.f32 %v488_v25, %v483_v27 }
 0xec9   :  { %v491_v21 = vpop.permute.xlu1 %490 }
 0xeca   :  { %v493_v30 = vmul.f32 %v748_v5, %v491_v21 }
 0xece   :  { %v496_v28 = vpop.permute.xlu1 %495 }
 0xecf   :  { %v498_v31 = vmul.f32 %v753_v6, %v496_v28 }
 0xed1   :  { %v500_v32 = vadd.f32 %v498_v31, %v493_v30 }
 0xed3   :  { %v501_v34 = vadd.f32 %v500_v32, %v499_v38 }
 0xed5   :  { %v502_v35 = vadd.f32 %v501_v34, %v477_v33 }
 0xed7   :  { %666 = vtanh.f32 %v502_v35 }
 0xee1   :  { %v667_v12 = vpop.eup %666 }
 0xee2   :  { %v504_v13 = vmul.f32 %v667_v12, %v780_v24 }
 0xee4   :  { %v505_v4 = vadd.f32 %v785_v26, %v504_v13 }
 0xee6   :  { %508 = vrot.lane.b32.xlu0 %v505_v4, %s696_s28  ;;  %v506_v5 = vmul.f32 %v505_v4, %v459_v14 }
 0xf58   :  { %v509_v3 = vpop.permute.xlu0 %508 }
 0xf59   :  { %v511_v37 = vmul.f32 %v509_v3, %v505_v4 }
 0xf5b   :  { %513 = vrot.lane.b32.xlu1 %v511_v37, %s697_s29 }
 0xfcd   :  { %v514_v6 = vpop.permute.xlu1 %513 }
 0xfce   :  { %v516_v39 = vadd.f32 %v514_v6, %v506_v5 }
 0xfd0   :  { %668 = vtanh.f32 %v516_v39 }
 0xfda   :  { %v669_v40 = vpop.eup %668 }
 0xfdb   :  { %519 = vrot.lane.b32.xlu0 %v669_v40, %s697_s29 }
0x104d   :  { %v520_v19 = vpop.permute.xlu0 %519 }
0x104e   :  { %v522_v43 = vmul.f32 %v520_v19, %v505_v4 }
0x1050   :  { %530 = vperm.xlu0 %632, %v522_v43   ;;  %525 = vperm.xlu1 %635, %v522_v43  }
0x1054   :  { %637 = vset.pattern.permute.xlu0 %v703_v42  ;;  %636 = vset.pattern.permute.xlu1 %v702_v41  ;;  %v574_v41 = vld [vmem:[%s948_s1 + $0xb] ss:$0 sm:$0xff] }
0x1055   :  { %540 = vperm.xlu0 %637, %v522_v43   ;;  %535 = vperm.xlu1 %636, %v522_v43  }
0x10cf   :  { %v531_v24 = vpop.permute.xlu0 %530  ;;  %v526_v26 = vpop.permute.xlu1 %525 }
0x10d0   :  { %v533_v42 = vmul.f32 %v573_v44, %v531_v24  ;;  %v528_v47 = vmul.f32 %v572_v45, %v526_v26 }
0x10d2   :  { %v544_v52 = vadd.f32 %v533_v42, %v528_v47 }
0x10d4   :  { %v541_v48 = vpop.permute.xlu0 %540  ;;  %v536_v49 = vpop.permute.xlu1 %535 }
0x10d5   :  { %v543_v50 = vmul.f32 %v575_v46, %v541_v48  ;;  %v538_v51 = vmul.f32 %v574_v41, %v536_v49 }
0x10d7   :  { %v545_v53 = vadd.f32 %v543_v50, %v538_v51 }
0x10d9   :  { %v546_v55 = vadd.f32 %v545_v53, %v544_v52 }
0x10db   :  { %v547_v56 = vadd.f32 %v576_v54, %v546_v55 }
0x10dd   :  { %548 = vst [vmem:[#allocation2] sm:$0x3] %v547_v56 }
0x10de   :  { %681 = shalt.err (!%p678_p4)
}
0x10df   :  { %s682_s16 = scalar_lea.hbm %s949_s2, 32 }
0x10e0   :  { %p683_p5 = scmp.ne.s32.totalorder %s949_s2, %s682_s16  ;;  %p686_p6 = scmp.lt.u32.totalorder %s682_s16, %s949_s2 }
0x10e2   :  { %p688_p7 = pnand %p686_p6, %p683_p5 }
0x10e4   :  { %691 = shalt.err (!%p688_p7)
}
0x10e5   :  { %558 = dma.vmem_to_hbm [thread:$0]  %s556_s13, 32, %s949_s2, [#allocation3]  }
0x10e6   :  { %692 = dma.done.wait [#allocation3], 32  }
0x10e7   :  { %693 = vsyncadd [#allocation3], 4294967264 }
0x10e8   :  { %562 = vsyncpa [#allocation3], 1 }

</bundles_post_ra>
